<compile_context>
chip_gen: v7x
topology: tpu7x:2x2x1
jax: 0.10.0
libtpu: 0.0.40
codegen_flags: <defaults>
</compile_context>

<pallas_src>
import functools

import numpy as np
import jax
import jax.numpy as jnp
from jax.experimental import pallas as pl
from jax.experimental.pallas import tpu as pltpu

SIZES = (1, 3, 6, 8)


def _adaptive_pool_matrix(in_size: int, out_size: int) -> np.ndarray:
    """A[i, h] = 1/window_len if h lies in the i-th adaptive-avg-pool window."""
    idx = np.arange(out_size)
    starts = np.floor(idx * in_size / out_size).astype(np.int64)
    ends = np.ceil((idx + 1) * in_size / out_size).astype(np.int64)
    A = np.zeros((out_size, in_size), dtype=np.float32)
    for i in range(out_size):
        A[i, starts[i]:ends[i]] = 1.0 / float(ends[i] - starts[i])
    return A


@functools.lru_cache(maxsize=None)
def _pooling_operator_t(h: int, w: int, sizes=SIZES) -> np.ndarray:
    """Transposed concatenated pooling operator W^T of shape (H*W, sum(s*s)), f32."""
    blocks = []
    for s in sizes:
        A_h = _adaptive_pool_matrix(h, s)          # (s, h)
        A_w = _adaptive_pool_matrix(w, s)          # (s, w)
        blocks.append(np.kron(A_h, A_w))           # (s*s, h*w)
    W = np.concatenate(blocks, axis=0)             # (P, K)
    return np.ascontiguousarray(W.T).astype(np.float32)   # (K, P)


def _vmem_capacity_bytes() -> int:
    """Per-core VMEM capacity; conservative fallback if the query is unavailable."""
    try:
        cap = int(getattr(pltpu.get_tpu_info(), "vmem_capacity_bytes", 0))
        if cap > 0:
            return cap
    except Exception:
        pass
    return 64 * 1024 * 1024      # v7x per-TensorCore VMEM (safe everywhere)


def _choose_tile_m(m: int, k: int, p: int, x_itemsize: int, vmem_cap: int) -> int:
    """Rows of x per grid step, sized from the double-buffered VMEM footprint."""
    budget = int(vmem_cap * 0.6)                        # headroom for compiler scratch
    w_bytes = 2 * k * p * 2                             # bf16 operator, 2 buffers
    per_row = 2 * (k * x_itemsize + p * 4)              # x tile + f32 out tile, 2 buffers
    tm_cap = 1024 if vmem_cap >= (96 << 20) else 512    # bigger tiles on 128 MiB parts
    tm = (budget - w_bytes) // per_row
    tm = max(8, min(tm, tm_cap))
    tm = (tm // 8) * 8                                  # sublane alignment
    # TODO(synk): if K=H*W is ever so large that tm lands below ~128, add a K
    # grid axis ("arbitrary") with an f32 VMEM accumulator instead of shrinking tm.
    if m > tm:
        return tm
    if m >= 128:
        # Whole problem fits one tile: still split into >=2 steps so the
        # "parallel" M axis can use both v7x TensorCores and overlap DMA/compute.
        return min(tm, (((m + 1) // 2) + 7) // 8 * 8)
    return m


def _psp_kernel(x_ref, w_ref, o_ref):
    # Cast the streamed f32 tile to bf16 on the VPU (the HBM stream stays f32,
    # no external cast pass); bf16 x bf16 dot with f32 accumulation on the MXU.
    x = x_ref[...].astype(jnp.bfloat16)
    o_ref[...] = jnp.dot(
        x, w_ref[...], preferred_element_type=jnp.float32
    ).astype(o_ref.dtype)


def psp_module(feats: jax.Array, sizes=SIZES) -> jax.Array:
    """feats: (N, C, H, W) -> (N, C, sum(s*s)); matches torch PSPModule.forward."""
    n, c, h, w = feats.shape
    sizes = tuple(sizes)
    out_dtype = feats.dtype
    x_itemsize = feats.dtype.itemsize

    pool_w_t = _pooling_operator_t(h, w, sizes)        # np (K, P) f32
    k, p = pool_w_t.shape
    m = n * c

    # Pooling operator in bf16; VMEM-resident across grid steps (constant index_map).
    w_t = jnp.asarray(pool_w_t, dtype=jnp.bfloat16)

    # x streams straight from HBM: the contiguous reshape is free (no pad/cast pass).
    x_flat = feats.reshape(m, k)

    vmem_cap = _vmem_capacity_bytes()
    tm = _choose_tile_m(m, k, p, x_itemsize, vmem_cap)
    grid = (pl.cdiv(m, tm),)

    cost = pl.CostEstimate(
        flops=2 * m * k * p,
        transcendentals=0,
        bytes_accessed=(m * k * x_itemsize             # streamed x
                        + k * p * 2                    # resident bf16 operator
                        + m * p * jnp.dtype(out_dtype).itemsize),
    )

    out_flat = pl.pallas_call(
        _psp_kernel,
        out_shape=jax.ShapeDtypeStruct((m, p), out_dtype),
        grid=grid,
        in_specs=[
            # x tiles stream over the grid (double-buffered by Pallas)...
            pl.BlockSpec((tm, k), lambda i: (i, 0)),
            # ...while the pooling operator stays resident in VMEM.
            pl.BlockSpec((k, p), lambda i: (0, 0)),
        ],
        # P equals the full output last dim -> no lane padding, and no
        # post-kernel slice pass over the output.
        out_specs=pl.BlockSpec((tm, p), lambda i: (i, 0)),
        compiler_params=pltpu.CompilerParams(
            dimension_semantics=("parallel",),          # rows independent -> megacore
            vmem_limit_bytes=int(vmem_cap * 0.75),
        ),
        cost_estimate=cost,
    )(x_flat, w_t)

    # Free metadata reshape; output is already exactly (M, P).
    return out_flat.reshape(n, c, p)


def _psp_reference(feats: jax.Array, sizes=SIZES) -> jax.Array:
    """Pure-JAX f32 reference mirroring torch AdaptiveAvgPool2d + cat."""
    n, c, h, w = feats.shape
    outs = []
    for s in sizes:
        A_h = jnp.asarray(_adaptive_pool_matrix(h, s))
        A_w = jnp.asarray(_adaptive_pool_matrix(w, s))
        pooled = jnp.einsum("ih,nchw,jw->ncij", A_h, feats, A_w)
        outs.append(pooled.reshape(n, c, s * s))
    return jnp.concatenate(outs, axis=-1)


if __name__ == "__main__":
    key = jax.random.PRNGKey(0)
    N, C, H, W = 2, 4, 16, 16
    feats = jax.random.normal(key, (N, C, H, W), dtype=jnp.float32)

    out = psp_module(feats)
    out = jax.block_until_ready(out)

    ref = _psp_reference(feats)
    assert out.shape == (N, C, sum(s * s for s in SIZES))
    # bf16 operands / f32 accumulation -> relaxed tolerance vs. the f32 reference.
    np.testing.assert_allclose(np.asarray(out), np.asarray(ref),
                               rtol=2e-2, atol=2e-2)

    print("KERNEL_OK")
</pallas_src>

<mosaic_0001>
module attributes {stable_mosaic.version = 11 : i64} {
  func.func @_psp_kernel(%arg0: i32, %arg1: memref<8x256xf32, #tpu.memory_space<vmem>>, %arg2: memref<256x110xbf16, #tpu.memory_space<vmem>>, %arg3: memref<8x110xf32, #tpu.memory_space<vmem>>) attributes {dimension_semantics = [#tpu.dimension_semantics<parallel>], iteration_bounds = array<i64: 1>, scalar_prefetch = 0 : i64, scratch_operands = 0 : i64, tpu.core_type = #tpu.core_type<tc>, window_params = [{transform_indices = @transform_0, window_bounds = array<i64: 8, 256>}, {pipeline_mode = #tpu.pipeline_mode<synchronous>, transform_indices = @transform_1, window_bounds = array<i64: 256, 110>}, {transform_indices = @transform_2, window_bounds = array<i64: 8, 110>}]} {
    %c0 = arith.constant 0 : index
    %c0_0 = arith.constant 0 : index
    %0 = vector.load %arg1[%c0, %c0_0] : memref<8x256xf32, #tpu.memory_space<vmem>>, vector<8x256xf32>
    %1 = arith.truncf %0 : vector<8x256xf32> to vector<8x256xbf16>
    %c0_1 = arith.constant 0 : index
    %c0_2 = arith.constant 0 : index
    %2 = vector.load %arg2[%c0_1, %c0_2] : memref<256x110xbf16, #tpu.memory_space<vmem>>, vector<256x110xbf16>
    %cst = arith.constant dense<0.000000e+00> : vector<8x110xf32>
    %3 = tpu.matmul %1, %2, %cst {dimension_numbers = #tpu.dot_dimension_numbers<[1], [0], [0], [1], [0, 0, 1, 1], [], []>} : vector<8x256xbf16>, vector<256x110xbf16>, vector<8x110xf32> -> vector<8x110xf32>
    %c0_3 = arith.constant 0 : index
    %c0_4 = arith.constant 0 : index
    %4 = vector.load %arg3[%c0_3, %c0_4] : memref<8x110xf32, #tpu.memory_space<vmem>>, vector<8x110xf32>
    tpu.vector_store %arg3[%c0_3, %c0_4], %3 {strides = array<i32>} : memref<8x110xf32, #tpu.memory_space<vmem>>, vector<8x110xf32>,
    return
  }
  func.func @transform_0(%arg0: i32) -> (i32, i32) {
    %c0_i32 = arith.constant 0 : i32
    %c0_i32_0 = arith.constant 0 : i32
    return %arg0, %c0_i32 : i32, i32
  }
  func.func @transform_1(%arg0: i32) -> (i32, i32) {
    %c0_i32 = arith.constant 0 : i32
    %c0_i32_0 = arith.constant 0 : i32
    %c0_i32_1 = arith.constant 0 : i32
    return %c0_i32, %c0_i32_0 : i32, i32
  }
  func.func @transform_2(%arg0: i32) -> (i32, i32) {
    %c0_i32 = arith.constant 0 : i32
    %c0_i32_0 = arith.constant 0 : i32
    return %arg0, %c0_i32 : i32, i32
  }
}

</mosaic_0001>

<bundles_post_ra>
// kernel: tpu_custom_call.1
= control target key start
LH: loop header
LB: loop body
LE: loop exit
PB: predicated region body
PF: predicated region fallthrough
CT: control target
= control target key end

     0   :  { %s362_s0 = inlined_call_operand.vmem [shape: f32[8,256], index: 0, kind: input, shape index: {}]   ;;  %s363_s1 = inlined_call_operand.vmem [shape: bf16[256,110], index: 1, kind: input, shape index: {}]   ;;  %s364_s2 = inlined_call_operand.hbm [shape: f32[8,110], index: 2, kind: output, shape index: {}]  }
   0x1   :  { %v240_v0 = vld [vmem:[%s363_s1 + $0x40] sm:$0xff]   ;;  %v242_v2 = vld [vmem:[%s363_s1 + $0x48] sm:$0xff]   ;;  %v244_v4 = vld [vmem:[%s363_s1 + $0x50] sm:$0xff]  }
   0x2   :  { %v241_v1 = vld [vmem:[%s363_s1] sm:$0xff]   ;;  %217 = vmatprep.subr.bf16.mxu0 %v240_v0  ;;  %v243_v3 = vld [vmem:[%s363_s1 + $0x8] sm:$0xff]   ;;  %v245_v5 = vld [vmem:[%s363_s1 + $0x10] sm:$0xff]  }
   0x3   :  { %218 = vmatpush3.bf16.msra.mxu0 %v241_v1  ;;  %v246_v6 = vld [vmem:[%s363_s1 + $0x58] sm:$0xff]   ;;  %v248_v8 = vld [vmem:[%s363_s1 + $0x60] sm:$0xff]   ;;  %v250_v10 = vld [vmem:[%s363_s1 + $0x68] sm:$0xff]  }
   0x4   :  { %219 = vmatprep.subr.bf16.mxu0 %v242_v2  ;;  %v247_v7 = vld [vmem:[%s363_s1 + $0x18] sm:$0xff]   ;;  %v249_v9 = vld [vmem:[%s363_s1 + $0x20] sm:$0xff]   ;;  %v14_v11 = vld [vmem:[%s362_s0 + $0x8] sm:$0xff] }
   0x7   :  { %220 = vmatpush3.bf16.msra.mxu0 %v243_v3 }
   0x8   :  { %221 = vmatprep.subr.bf16.mxu0 %v244_v4 }
   0xb   :  { %222 = vmatpush3.bf16.msra.mxu0 %v245_v5 }
   0xc   :  { %223 = vmatprep.subr.bf16.mxu0 %v246_v6 }
   0xf   :  { %224 = vmatpush3.bf16.msra.mxu0 %v247_v7 }
  0x10   :  { %225 = vmatprep.subr.bf16.mxu0 %v248_v8 }
  0x11   :  { %7 = vsyncpa [#allocation3], 0  ;;  %v16_v12 = vpack.c.bf16 %v14_v11, %v14_v11  ;;  %v251_v13 = vld [vmem:[%s363_s1 + $0x28] sm:$0xff]   ;;  %v252_v14 = vld [vmem:[%s363_s1 + $0x70] sm:$0xff]   ;;  %s280_s17 = smov [#allocation2]   ;;  %vm185_vm0 = vcmask 900096  }
  0x12   :  { %v253_v15 = vld [vmem:[%s363_s1 + $0x30] sm:$0xff]   ;;  %v254_v16 = vld [vmem:[%s363_s1 + $0x78] sm:$0xff]   ;;  %v13_v18 = vld [vmem:[%s362_s0] sm:$0xff]  ;;  %s193_s18 = sshll.u32 %s280_s17, 4  ;;  %s194_s18 = int_to_ptr.vmem [resolvable:$true] %s193_s18 }
  0x13   :  { %226 = vmatpush3.bf16.msra.mxu0 %v249_v9  ;;  %177 = vmatprep.mubr.bf16.mxu0 %v16_v12  ;;  %v255_v17 = vld [vmem:[%s363_s1 + $0x38] sm:$0xff]   ;;  %v15_v19 = vpack.c.bf16 %v13_v18, %v13_v18  ;;  %s256_s19 = scalar_lea.vmem %s194_s18, 128  ;;  %p261_p1 = scmp.lt.s32.totalorder %s194_s18, %s194_s18 }
  0x14   :  { %227 = vmatprep.subr.bf16.mxu0 %v250_v10  ;;  %p257_p0 = scmp.ne.s32.totalorder %s194_s18, %s256_s19  ;;  %p262_p2 = scmp.lt.s32.totalorder %s256_s19, %s256_s19 }
  0x16   :  { %p263_p3 = por %p262_p2, %p261_p1 }
  0x17   :  { %228 = vmatpush3.bf16.msra.mxu0 %v251_v13 }
  0x18   :  { %229 = vmatprep.subr.bf16.mxu0 %v252_v14  ;;  %p264_p4 = pnand %p263_p3, %p257_p0 }
  0x1b   :  { %230 = vmatpush3.bf16.msra.mxu0 %v253_v15 }
  0x1c   :  { %231 = vmatprep.subr.bf16.mxu0 %v254_v16 }
  0x1f   :  { %232 = vmatpush3.bf16.msra.mxu0 %v255_v17 }
  0x22   :  { %178 = vmatmul.mubr.bf16.vlgmr.msra.gmra.mrb[0].mxu0 %v15_v19 }
  0xf5   :  { %v233_v20 = vpop.f32.mrb[0].mxu0 }
  0xf6   :  { %v234_v21 = vpop.f32.mrb[1].mxu0 }
  0xf7   :  { %v235_v22 = vadd.f32 %v234_v21, %v233_v20  ;;  %v236_v23 = vpop.f32.mrb[2].mxu0 }
  0xf8   :  { %v237_v24 = vpop.f32.mrb[3].mxu0 }
  0xf9   :  { %186 = vst.msk [vmem:[#allocation2] sm:$0xff] %vm185_vm0, %v235_v22 }
  0xfa   :  { %267 = shalt.err (!%p264_p4)
}
  0xfb   :  { %s268_s20 = scalar_lea.hbm %s364_s2, 128 }
  0xfc   :  { %p269_p5 = scmp.ne.s32.totalorder %s364_s2, %s268_s20  ;;  %p272_p6 = scmp.lt.u32.totalorder %s268_s20, %s364_s2 }
  0xfe   :  { %p274_p7 = pnand %p272_p6, %p269_p5 }
 0x100   :  { %277 = shalt.err (!%p274_p7)
}
 0x101   :  { %196 = dma.vmem_to_hbm [thread:$0]  %s194_s18, 128, %s364_s2, [#allocation3]  }
 0x102   :  { %278 = dma.done.wait [#allocation3], 128  }
 0x103   :  { %279 = vsyncadd [#allocation3], 4294967168 }
 0x104   :  { %200 = vsyncpa [#allocation3], 1 }

</bundles_post_ra>
